<compile_context>
chip_gen: v5e
topology: v5e:2x2
jax: 0.10.0
libtpu: 0.0.40
codegen_flags: <defaults>
</compile_context>

<pallas_src>
import functools

import jax
import jax.numpy as jnp
from jax.experimental import pallas as pl
from jax.experimental.pallas import tpu as pltpu

N_EMBD = 60
HIDDEN = 4 * N_EMBD          # 240
DROPOUT_P = 0.2

# Lane-dense padded feature sizes.
C_PAD = 128                  # 60  -> 128
H_PAD = 256                  # 240 -> 256 (full MXU width on v6e/v7x)

TILE_M_DEFAULT = 512         # rows per grid step (~0.5 MB/tile slab in f32)


def _round_up(x, m):
    return (x + m - 1) // m * m


def ffn_kernel(*refs, train):
    if train:
        x_ref, w1_ref, b1_ref, w2_ref, b2_ref, mask_ref, o_ref = refs
    else:
        x_ref, w1_ref, b1_ref, w2_ref, b2_ref, o_ref = refs

    # Linear 1 + ReLU (MXU matmul, f32 accumulation).
    h = jnp.dot(x_ref[...], w1_ref[...], preferred_element_type=jnp.float32)
    h = jnp.maximum(h + b1_ref[...], 0.0)

    # Linear 2.
    y = jnp.dot(h, w2_ref[...], preferred_element_type=jnp.float32) + b2_ref[...]

    if train:
        # Inverted dropout: mask already holds {0, 1/(1-p)}.
        y = y * mask_ref[...]

    o_ref[...] = y.astype(o_ref.dtype)


def feed_forward(x, params, *, key=None, train=True, tile_m=TILE_M_DEFAULT):
    """x: (B, T, n_embd) float32. Returns same shape."""
    w1, b1, w2, b2 = params
    B, T, C = x.shape
    assert C == N_EMBD
    M = B * T

    # Row tiling: clamp for tiny inputs, keep rows a multiple of 8 (sublanes).
    TILE_M = min(tile_m, _round_up(M, 8))
    M_pad = _round_up(M, TILE_M)
    grid = (M_pad // TILE_M,)

    # Zero-pad to lane-dense shapes (exact; see header comment).
    x2 = jnp.zeros((M_pad, C_PAD), x.dtype).at[:M, :C].set(x.reshape(M, C))
    w1p = jnp.zeros((C_PAD, H_PAD), w1.dtype).at[:C, :HIDDEN].set(w1)
    b1p = jnp.zeros((1, H_PAD), b1.dtype).at[0, :HIDDEN].set(b1)
    w2p = jnp.zeros((H_PAD, C_PAD), w2.dtype).at[:HIDDEN, :C].set(w2)
    b2p = jnp.zeros((1, C_PAD), b2.dtype).at[0, :C].set(b2)

    row_spec = pl.BlockSpec((TILE_M, C_PAD), lambda i: (i, 0))

    def const_spec(shape):
        return pl.BlockSpec(shape, lambda i: (0, 0))   # weights stay VMEM-resident

    in_specs = [
        row_spec,                       # x tile
        const_spec((C_PAD, H_PAD)),     # w1
        const_spec((1, H_PAD)),         # b1
        const_spec((H_PAD, C_PAD)),     # w2
        const_spec((1, C_PAD)),         # b2
    ]
    inputs = [x2, w1p, b1p, w2p, b2p]

    if train:
        if key is None:
            key = jax.random.PRNGKey(0)
        keep = jax.random.bernoulli(key, 1.0 - DROPOUT_P, (M_pad, C_PAD))
        mask = keep.astype(jnp.float32) * (1.0 / (1.0 - DROPOUT_P))
        in_specs.append(row_spec)
        inputs.append(mask)

    out = pl.pallas_call(
        functools.partial(ffn_kernel, train=train),
        out_shape=jax.ShapeDtypeStruct((M_pad, C_PAD), x.dtype),
        grid=grid,
        in_specs=in_specs,
        out_specs=row_spec,
        compiler_params=pltpu.CompilerParams(
            dimension_semantics=("parallel",),
            vmem_limit_bytes=32 * 1024 * 1024,
        ),
    )(*inputs)

    return out[:M, :C].reshape(B, T, C)


def init_params(key):
    """Deterministic PyTorch-Linear-style init: U(-1/sqrt(fan_in), 1/sqrt(fan_in))."""
    k1, k2, k3, k4 = jax.random.split(key, 4)
    bound1 = 1.0 / (N_EMBD ** 0.5)
    bound2 = 1.0 / (HIDDEN ** 0.5)
    w1 = jax.random.uniform(k1, (N_EMBD, HIDDEN), jnp.float32, -bound1, bound1)
    b1 = jax.random.uniform(k2, (HIDDEN,), jnp.float32, -bound1, bound1)
    w2 = jax.random.uniform(k3, (HIDDEN, N_EMBD), jnp.float32, -bound2, bound2)
    b2 = jax.random.uniform(k4, (N_EMBD,), jnp.float32, -bound2, bound2)
    return w1, b1, w2, b2


def reference_eval(x, params):
    """Plain-JAX reference for eval mode (dropout = identity)."""
    w1, b1, w2, b2 = params
    h = jnp.maximum(x @ w1 + b1, 0.0)
    return h @ w2 + b2


if __name__ == "__main__":
    key = jax.random.PRNGKey(0)
    kx, kp, kd = jax.random.split(key, 3)

    B, T = 2, 8
    x = jax.random.normal(kx, (B, T, N_EMBD), dtype=jnp.float32)
    params = init_params(kp)

    # Eval mode (dropout off): check against plain-JAX reference.
    y_eval = jax.block_until_ready(feed_forward(x, params, train=False))
    y_ref = reference_eval(x, params)
    assert jnp.allclose(y_eval, y_ref, atol=1e-4, rtol=1e-4), "eval mismatch"

    # Training mode: dropout (p=0.2, inverted scaling) with a per-call key.
    y_train = jax.block_until_ready(feed_forward(x, params, key=kd, train=True))
    assert y_train.shape == (B, T, N_EMBD)
    assert bool(jnp.all(jnp.isfinite(y_train)))

    print("KERNEL_OK")
</pallas_src>

<mosaic_0001>
module attributes {stable_mosaic.version = 11 : i64} {
  func.func @ffn_kernel(%arg0: i32, %arg1: memref<16x128xf32, #tpu.memory_space<vmem>>, %arg2: memref<128x256xf32, #tpu.memory_space<vmem>>, %arg3: memref<1x256xf32, #tpu.memory_space<vmem>>, %arg4: memref<256x128xf32, #tpu.memory_space<vmem>>, %arg5: memref<1x128xf32, #tpu.memory_space<vmem>>, %arg6: memref<16x128xf32, #tpu.memory_space<vmem>>) attributes {dimension_semantics = [#tpu.dimension_semantics<parallel>], iteration_bounds = array<i64: 1>, scalar_prefetch = 0 : i64, scratch_operands = 0 : i64, tpu.core_type = #tpu.core_type<tc>, window_params = [{transform_indices = @transform_0, window_bounds = array<i64: 16, 128>}, {pipeline_mode = #tpu.pipeline_mode<synchronous>, transform_indices = @transform_1, window_bounds = array<i64: 128, 256>}, {pipeline_mode = #tpu.pipeline_mode<synchronous>, transform_indices = @transform_2, window_bounds = array<i64: 1, 256>}, {pipeline_mode = #tpu.pipeline_mode<synchronous>, transform_indices = @transform_3, window_bounds = array<i64: 256, 128>}, {pipeline_mode = #tpu.pipeline_mode<synchronous>, transform_indices = @transform_4, window_bounds = array<i64: 1, 128>}, {transform_indices = @transform_5, window_bounds = array<i64: 16, 128>}]} {
    %c0 = arith.constant 0 : index
    %c0_0 = arith.constant 0 : index
    %0 = vector.load %arg1[%c0, %c0_0] : memref<16x128xf32, #tpu.memory_space<vmem>>, vector<16x128xf32>
    %c0_1 = arith.constant 0 : index
    %c0_2 = arith.constant 0 : index
    %1 = vector.load %arg2[%c0_1, %c0_2] : memref<128x256xf32, #tpu.memory_space<vmem>>, vector<128x256xf32>
    %cst = arith.constant dense<0.000000e+00> : vector<16x256xf32>
    %2 = tpu.matmul %0, %1, %cst {dimension_numbers = #tpu.dot_dimension_numbers<[1], [0], [0], [1], [0, 0, 1, 1], [], []>} : vector<16x128xf32>, vector<128x256xf32>, vector<16x256xf32> -> vector<16x256xf32>
    %c0_3 = arith.constant 0 : index
    %c0_4 = arith.constant 0 : index
    %3 = vector.load %arg3[%c0_3, %c0_4] : memref<1x256xf32, #tpu.memory_space<vmem>>, vector<1x256xf32>
    %4 = vector.broadcast %3 : vector<1x256xf32> to vector<16x256xf32>
    %5 = arith.addf %2, %4 : vector<16x256xf32>
    %cst_5 = arith.constant 0.000000e+00 : f32
    %6 = vector.broadcast %cst_5 : f32 to vector<16x256xf32>
    %7 = arith.maximumf %5, %6 : vector<16x256xf32>
    %c0_6 = arith.constant 0 : index
    %c0_7 = arith.constant 0 : index
    %8 = vector.load %arg4[%c0_6, %c0_7] : memref<256x128xf32, #tpu.memory_space<vmem>>, vector<256x128xf32>
    %cst_8 = arith.constant dense<0.000000e+00> : vector<16x128xf32>
    %9 = tpu.matmul %7, %8, %cst_8 {dimension_numbers = #tpu.dot_dimension_numbers<[1], [0], [0], [1], [0, 0, 1, 1], [], []>} : vector<16x256xf32>, vector<256x128xf32>, vector<16x128xf32> -> vector<16x128xf32>
    %c0_9 = arith.constant 0 : index
    %c0_10 = arith.constant 0 : index
    %10 = vector.load %arg5[%c0_9, %c0_10] : memref<1x128xf32, #tpu.memory_space<vmem>>, vector<1x128xf32>
    %11 = vector.broadcast %10 : vector<1x128xf32> to vector<16x128xf32>
    %12 = arith.addf %9, %11 : vector<16x128xf32>
    %c0_11 = arith.constant 0 : index
    %c0_12 = arith.constant 0 : index
    %13 = vector.load %arg6[%c0_11, %c0_12] : memref<16x128xf32, #tpu.memory_space<vmem>>, vector<16x128xf32>
    tpu.vector_store %arg6[%c0_11, %c0_12], %12 {strides = array<i32>} : memref<16x128xf32, #tpu.memory_space<vmem>>, vector<16x128xf32>,
    return
  }
  func.func @transform_0(%arg0: i32) -> (i32, i32) {
    %c0_i32 = arith.constant 0 : i32
    %c0_i32_0 = arith.constant 0 : i32
    return %arg0, %c0_i32 : i32, i32
  }
  func.func @transform_1(%arg0: i32) -> (i32, i32) {
    %c0_i32 = arith.constant 0 : i32
    %c0_i32_0 = arith.constant 0 : i32
    %c0_i32_1 = arith.constant 0 : i32
    return %c0_i32, %c0_i32_0 : i32, i32
  }
  func.func @transform_2(%arg0: i32) -> (i32, i32) {
    %c0_i32 = arith.constant 0 : i32
    %c0_i32_0 = arith.constant 0 : i32
    %c0_i32_1 = arith.constant 0 : i32
    return %c0_i32, %c0_i32_0 : i32, i32
  }
  func.func @transform_3(%arg0: i32) -> (i32, i32) {
    %c0_i32 = arith.constant 0 : i32
    %c0_i32_0 = arith.constant 0 : i32
    %c0_i32_1 = arith.constant 0 : i32
    return %c0_i32, %c0_i32_0 : i32, i32
  }
  func.func @transform_4(%arg0: i32) -> (i32, i32) {
    %c0_i32 = arith.constant 0 : i32
    %c0_i32_0 = arith.constant 0 : i32
    %c0_i32_1 = arith.constant 0 : i32
    return %c0_i32, %c0_i32_0 : i32, i32
  }
  func.func @transform_5(%arg0: i32) -> (i32, i32) {
    %c0_i32 = arith.constant 0 : i32
    %c0_i32_0 = arith.constant 0 : i32
    return %arg0, %c0_i32 : i32, i32
  }
}

</mosaic_0001>

<bundles_post_ra>
// kernel: tpu_custom_call.1
= control target key start
LH: loop header
LB: loop body
LE: loop exit
PB: predicated region body
PF: predicated region fallthrough
CT: control target
= control target key end

     0   :  { %10 = vsyncpa [#allocation3], 0  ;;  %s481_s0 = inlined_call_operand.hbm [shape: f32[16,128], index: 0, kind: input, shape index: {}]   ;;  %s482_s1 = inlined_call_operand.hbm [shape: f32[128,256], index: 1, kind: input, shape index: {}]   ;;  %s483_s2 = inlined_call_operand.hbm [shape: f32[1,256], index: 2, kind: input, shape index: {}]   ;;  %s484_s3 = inlined_call_operand.hbm [shape: f32[256,128], index: 3, kind: input, shape index: {}]   ;;  %s485_s4 = inlined_call_operand.vmem [shape: f32[1,128], index: 4, kind: input, shape index: {}]   ;;  %s486_s5 = inlined_call_operand.hbm [shape: f32[16,128], index: 5, kind: output, shape index: {}]  }
   0x1   :  { %11 = vsyncpa [#allocation6], 0 }
   0x2   :  { %12 = vsyncpa [#allocation9], 0  ;;  %s31_s20 = sshll.u32 %s482_s1, 4  ;;  %s32_s20 = int_to_ptr.hbm [resolvable:$true] %s31_s20 }
   0x3   :  { %13 = vsyncpa [#allocation4], 0  ;;  %s415_s21 = smov [#allocation5]   ;;  %s18_s25 = sshll.u32 %s481_s0, 4  ;;  %s19_s25 = int_to_ptr.hbm [resolvable:$true] %s18_s25 }
   0x4   :  { %s33_s22 = sshll.u32 %s415_s21, 4  ;;  %s416_s26 = smov 256   ;;  %s34_s22 = int_to_ptr.vmem [resolvable:$true] %s33_s22 }
   0x5   :  { %s417_s27 = smov 16   ;;  %s418_s28 = smov [#allocation2]  }
   0x6   :  { %39 = dma.hbm_to_vmem [thread:$0]  %s32_s20, 4096, %s34_s22, [#allocation6], %s416_s26, %s416_s26, %s417_s27  }
   0x7   :  { %s20_s29 = sshll.u32 %s418_s28, 4  ;;  %s419_s30 = smov 128   ;;  %s21_s29 = int_to_ptr.vmem [resolvable:$true] %s20_s29 }
   0x8   :  { %s420_s6 = smov 8   ;;  %s45_s8 = sshll.u32 %s483_s2, 4  ;;  %s46_s8 = int_to_ptr.hbm [resolvable:$true] %s45_s8 }
   0x9   :  { %26 = dma.hbm_to_vmem [thread:$0]  %s19_s25, 256, %s21_s29, [#allocation3], %s419_s30, %s419_s30, %s420_s6  }
   0xa   :  { %s421_s9 = smov [#allocation7]   ;;  %s55_s12 = sshll.u32 %s484_s3, 4  ;;  %s56_s12 = int_to_ptr.hbm [resolvable:$true] %s55_s12 }
   0xb   :  { %s47_s0 = sshll.u32 %s421_s9, 4  ;;  %s422_s13 = smov [#allocation8]   ;;  %s48_s0 = int_to_ptr.vmem [resolvable:$true] %s47_s0 }
   0xc   :  { %50 = dma.hbm_to_vmem [thread:$0]  %s46_s8, 32, %s48_s0, [#allocation6]  }
   0xd   :  { %s57_s14 = sshll.u32 %s422_s13, 4  ;;  %s58_s14 = int_to_ptr.vmem [resolvable:$true] %s57_s14 }
   0xe   :  { %63 = dma.hbm_to_vmem [thread:$0]  %s56_s12, 4096, %s58_s14, [#allocation9], %s419_s30, %s419_s30, %s420_s6  }
   0xf   :  { %407 = dma.done.wait [#allocation3], 256  }
  0x10   :  { %408 = vsyncadd [#allocation3], 4294967040 }
  0x11   :  { %409 = dma.done.wait [#allocation6], 4128  }
  0x12   :  { %410 = vsyncadd [#allocation6], 4294963168 }
  0x13   :  { %411 = dma.done.wait [#allocation9], 4096  }
  0x14   :  { %412 = vsyncadd [#allocation9], 4294963200  ;;  %v114_v0 = vld [vmem:[#allocation5 + $0xf0] sm:$0xff]  ;;  %v112_v1 = vld [vmem:[#allocation5 + $0xe0] sm:$0xff]  ;;  %s423_s15 = smov [#allocation10]   ;;  %s262_s19 = sshll.u32 %s486_s5, 4  ;;  %s263_s19 = int_to_ptr.hbm [resolvable:$true] %s262_s19 }
  0x15   :  { %v115_v2 = vld [vmem:[#allocation5 + $0xf8] sm:$0xff]  ;;  %122 = vmatpush.msra.mxu0 %v114_v0  ;;  %v113_v3 = vld [vmem:[#allocation5 + $0xe8] sm:$0xff]  ;;  %v110_v4 = vld [vmem:[#allocation5 + $0xd0] sm:$0xff]  ;;  %s260_s16 = sshll.u32 %s423_s15, 4  ;;  %s261_s16 = int_to_ptr.vmem [resolvable:$true] %s260_s16 }
  0x16   :  { %145 = vmatpush.msra.mxu1 %v115_v2  ;;  %v111_v5 = vld [vmem:[#allocation5 + $0xd8] sm:$0xff]  ;;  %v108_v6 = vld [vmem:[#allocation5 + $0xc0] sm:$0xff]  ;;  %v109_v7 = vld [vmem:[#allocation5 + $0xc8] sm:$0xff] }
  0x17   :  { %123 = vmatpush.msra.mxu0 %v112_v1  ;;  %v106_v8 = vld [vmem:[#allocation5 + $0xb0] sm:$0xff]  ;;  %v107_v9 = vld [vmem:[#allocation5 + $0xb8] sm:$0xff]  ;;  %v104_v10 = vld [vmem:[#allocation5 + $0xa0] sm:$0xff] }
  0x18   :  { %146 = vmatpush.msra.mxu1 %v113_v3  ;;  %v105_v11 = vld [vmem:[#allocation5 + $0xa8] sm:$0xff]  ;;  %v102_v12 = vld [vmem:[#allocation5 + $0x90] sm:$0xff]  ;;  %v103_v13 = vld [vmem:[#allocation5 + $0x98] sm:$0xff] }
  0x19   :  { %124 = vmatpush.msra.mxu0 %v110_v4  ;;  %v187_v14 = vld [vmem:[#allocation8 + $0x78] sm:$0xff]  ;;  %v186_v15 = vld [vmem:[#allocation8 + $0x70] sm:$0xff]  ;;  %v101_v17 = vld [vmem:[#allocation5 + $0x88] sm:$0xff] }
  0x1a   :  { %147 = vmatpush.msra.mxu1 %v111_v5  ;;  %v100_v16 = vld [vmem:[#allocation5 + $0x80] sm:$0xff]  ;;  %208 = vmatpush.msra.mxu2 %v187_v14  ;;  %v185_v19 = vld [vmem:[#allocation8 + $0x68] sm:$0xff]  ;;  %v202_v20 = vld [vmem:[#allocation8 + $0xf0] sm:$0xff] }
  0x1b   :  { %125 = vmatpush.msra.mxu0 %v108_v6  ;;  %v203_v18 = vld [vmem:[#allocation8 + $0xf8] sm:$0xff]  ;;  %v98_v21 = vld [vmem:[#allocation5 + $0x70] sm:$0xff]  ;;  %v184_v23 = vld [vmem:[#allocation8 + $0x60] sm:$0xff] }
  0x1c   :  { %148 = vmatpush.msra.mxu1 %v109_v7  ;;  %v99_v22 = vld [vmem:[#allocation5 + $0x78] sm:$0xff]  ;;  %209 = vmatpush.msra.mxu2 %v186_v15  ;;  %v201_v24 = vld [vmem:[#allocation8 + $0xe8] sm:$0xff]  ;;  %v96_v25 = vld [vmem:[#allocation5 + $0x60] sm:$0xff] }
  0x1d   :  { %126 = vmatpush.msra.mxu0 %v106_v8  ;;  %231 = vmatpush.msra.mxu3 %v203_v18  ;;  %v97_v26 = vld [vmem:[#allocation5 + $0x68] sm:$0xff]  ;;  %v183_v27 = vld [vmem:[#allocation8 + $0x58] sm:$0xff]  ;;  %v94_v29 = vld [vmem:[#allocation5 + $0x50] sm:$0xff] }
  0x1e   :  { %149 = vmatpush.msra.mxu1 %v107_v9  ;;  %210 = vmatpush.msra.mxu2 %v185_v19  ;;  %v200_v28 = vld [vmem:[#allocation8 + $0xe0] sm:$0xff]  ;;  %v95_v30 = vld [vmem:[#allocation5 + $0x58] sm:$0xff]  ;;  %v181_v35 = vld [vmem:[#allocation8 + $0x48] sm:$0xff] }
  0x1f   :  { %127 = vmatpush.msra.mxu0 %v104_v10  ;;  %232 = vmatpush.msra.mxu3 %v202_v20  ;;  %v182_v31 = vld [vmem:[#allocation8 + $0x50] sm:$0xff]  ;;  %v199_v32 = vld [vmem:[#allocation8 + $0xd8] sm:$0xff]  ;;  %v93_v34 = vld [vmem:[#allocation5 + $0x48] sm:$0xff] }
  0x20   :  { %150 = vmatpush.msra.mxu1 %v105_v11  ;;  %211 = vmatpush.msra.mxu2 %v184_v23  ;;  %v92_v33 = vld [vmem:[#allocation5 + $0x40] sm:$0xff]  ;;  %v198_v36 = vld [vmem:[#allocation8 + $0xd0] sm:$0xff]  ;;  %v197_v40 = vld [vmem:[#allocation8 + $0xc8] sm:$0xff] }
  0x21   :  { %128 = vmatpush.msra.mxu0 %v102_v12  ;;  %233 = vmatpush.msra.mxu3 %v201_v24  ;;  %v90_v37 = vld [vmem:[#allocation5 + $0x30] sm:$0xff]  ;;  %v91_v38 = vld [vmem:[#allocation5 + $0x38] sm:$0xff]  ;;  %v180_v39 = vld [vmem:[#allocation8 + $0x40] sm:$0xff] }
  0x22   :  { %151 = vmatpush.msra.mxu1 %v103_v13  ;;  %212 = vmatpush.msra.mxu2 %v183_v27  ;;  %v88_v41 = vld [vmem:[#allocation5 + $0x20] sm:$0xff]  ;;  %v89_v42 = vld [vmem:[#allocation5 + $0x28] sm:$0xff]  ;;  %v86_v45 = vld [vmem:[#allocation5 + $0x10] sm:$0xff] }
  0x23   :  { %129 = vmatpush.msra.mxu0 %v100_v16  ;;  %234 = vmatpush.msra.mxu3 %v200_v28  ;;  %v179_v43 = vld [vmem:[#allocation8 + $0x38] sm:$0xff]  ;;  %v196_v44 = vld [vmem:[#allocation8 + $0xc0] sm:$0xff]  ;;  %v178_v47 = vld [vmem:[#allocation8 + $0x30] sm:$0xff] }
  0x24   :  { %152 = vmatpush.msra.mxu1 %v101_v17  ;;  %213 = vmatpush.msra.mxu2 %v182_v31  ;;  %v87_v46 = vld [vmem:[#allocation5 + $0x18] sm:$0xff]  ;;  %v84_v49 = vld [vmem:[#allocation5] sm:$0xff]  ;;  %v85_v50 = vld [vmem:[#allocation5 + $0x8] sm:$0xff] }
  0x25   :  { %130 = vmatpush.msra.mxu0 %v98_v21  ;;  %235 = vmatpush.msra.mxu3 %v199_v32  ;;  %v195_v48 = vld [vmem:[#allocation8 + $0xb8] sm:$0xff]  ;;  %v82_v51 = vld [vmem:[#allocation2] sm:$0xff]  ;;  %v176_v54 = vld [vmem:[#allocation8 + $0x20] sm:$0xff] }
  0x26   :  { %153 = vmatpush.msra.mxu1 %v99_v22  ;;  %214 = vmatpush.msra.mxu2 %v181_v35  ;;  %v177_v52 = vld [vmem:[#allocation8 + $0x28] sm:$0xff]  ;;  %v194_v53 = vld [vmem:[#allocation8 + $0xb0] sm:$0xff]  ;;  %v175_v56 = vld [vmem:[#allocation8 + $0x18] sm:$0xff] }
  0x27   :  { %131 = vmatpush.msra.mxu0 %v96_v25  ;;  %236 = vmatpush.msra.mxu3 %v198_v36  ;;  %v193_v55 = vld [vmem:[#allocation8 + $0xa8] sm:$0xff]  ;;  %v192_v57 = vld [vmem:[#allocation8 + $0xa0] sm:$0xff]  ;;  %v83_v58 = vld [vmem:[#allocation2 + $0x8] sm:$0xff] }
  0x28   :  { %154 = vmatpush.msra.mxu1 %v97_v26  ;;  %215 = vmatpush.msra.mxu2 %v180_v39  ;;  %v174_v59 = vld [vmem:[#allocation8 + $0x10] sm:$0xff]  ;;  %v191_v60 = vld [vmem:[#allocation8 + $0x98] sm:$0xff]  ;;  %v173_v61 = vld [vmem:[#allocation8 + $0x8] sm:$0xff] }
  0x29   :  { %132 = vmatpush.msra.mxu0 %v94_v29  ;;  %237 = vmatpush.msra.mxu3 %v197_v40  ;;  %v190_v62 = vld [vmem:[#allocation8 + $0x90] sm:$0xff]  ;;  %v172_v63 = vld [vmem:[#allocation8] sm:$0xff]  ;;  %v189_v0 = vld [vmem:[#allocation8 + $0x88] sm:$0xff] }
  0x2a   :  { %155 = vmatpush.msra.mxu1 %v95_v30  ;;  %216 = vmatpush.msra.mxu2 %v179_v43  ;;  %v188_v1 = vld [vmem:[#allocation8 + $0x80] sm:$0xff]  ;;  %v116_v2 = vld [vmem:[#allocation7] sm:$0x3]  ;;  %v286_v17 = vld [vmem:[%s485_s4] ss:$0 sm:$0xff] }
  0x2b   :  { %133 = vmatpush.msra.mxu0 %v92_v33  ;;  %238 = vmatpush.msra.mxu3 %v196_v44  ;;  %v118_v3 = vperm.slane %v116_v2, 0  ;;  %v119_v4 = vperm.slane %v116_v2, 1 }
  0x2c   :  { %156 = vmatpush.msra.mxu1 %v93_v34  ;;  %217 = vmatpush.msra.mxu2 %v178_v47 }
  0x2d   :  { %134 = vmatpush.msra.mxu0 %v90_v37  ;;  %239 = vmatpush.msra.mxu3 %v195_v48 }
  0x2e   :  { %157 = vmatpush.msra.mxu1 %v91_v38  ;;  %218 = vmatpush.msra.mxu2 %v177_v52 }
  0x2f   :  { %135 = vmatpush.msra.mxu0 %v88_v41  ;;  %240 = vmatpush.msra.mxu3 %v194_v53 }
  0x30   :  { %158 = vmatpush.msra.mxu1 %v89_v42  ;;  %219 = vmatpush.msra.mxu2 %v176_v54 }
  0x31   :  { %136 = vmatpush.msra.mxu0 %v86_v45  ;;  %241 = vmatpush.msra.mxu3 %v193_v55 }
  0x32   :  { %159 = vmatpush.msra.mxu1 %v87_v46  ;;  %220 = vmatpush.msra.mxu2 %v175_v56 }
  0x33   :  { %137 = vmatpush.msra.mxu0 %v84_v49  ;;  %242 = vmatpush.msra.mxu3 %v192_v57 }
  0x34   :  { %160 = vmatpush.msra.mxu1 %v85_v50  ;;  %138 = vmatmul.f32.vlgmr.msra.gmra.mxu0 %v82_v51 }
  0x35   :  { %161 = vmatmul.f32.vlgmr.msra.gmra.mxu1 %v82_v51  ;;  %221 = vmatpush.msra.mxu2 %v174_v59 }
  0x36   :  { %243 = vmatpush.msra.mxu3 %v191_v60 }
  0x37   :  { %222 = vmatpush.msra.mxu2 %v173_v61 }
  0x38   :  { %244 = vmatpush.msra.mxu3 %v190_v62 }
  0x39   :  { %223 = vmatpush.msra.mxu2 %v172_v63 }
  0x3a   :  { %245 = vmatpush.msra.mxu3 %v189_v0 }
  0x3c   :  { %141 = vmatmul.f32.gmra.mxu0 %v83_v58  ;;  %246 = vmatpush.msra.mxu3 %v188_v1 }
  0x3d   :  { %164 = vmatmul.f32.gmra.mxu1 %v83_v58 }
  0xb1   :  { %v139_v5 = vpop.f32.mrf.mxu0 }
  0xb2   :  { %v162_v6 = vpop.f32.mrf.mxu1  ;;  %v140_v7 = vadd.f32 %v139_v5, %v118_v3 }
  0xb3   :  { %v163_v8 = vadd.f32 %v162_v6, %v119_v4 }
  0xb4   :  { %v168_v9 = vmax.f32 %v140_v7, 0.0 }
  0xb5   :  { %v169_v10 = vmax.f32 %v163_v8, 0.0 }
  0xb6   :  { %224 = vmatmul.f32.vlgmr.msra.gmra.mxu2 %v168_v9 }
  0xb7   :  { %247 = vmatmul.f32.vlgmr.msra.gmra.mxu3 %v169_v10 }
  0xb9   :  { %v142_v11 = vpop.f32.mrf.mxu0 }
  0xba   :  { %v165_v12 = vpop.f32.mrf.mxu1  ;;  %v143_v13 = vadd.f32 %v142_v11, %v118_v3 }
  0xbb   :  { %v166_v14 = vadd.f32 %v165_v12, %v119_v4 }
  0xbc   :  { %v170_v15 = vmax.f32 %v143_v13, 0.0 }
  0xbd   :  { %v171_v16 = vmax.f32 %v166_v14, 0.0 }
  0xbe   :  { %227 = vmatmul.f32.gmra.mxu2 %v170_v15 }
  0xbf   :  { %250 = vmatmul.f32.gmra.mxu3 %v171_v16 }
 0x139   :  { %v225_v18 = vpop.f32.mrf.mxu2 }
 0x13a   :  { %v248_v19 = vpop.f32.mrf.mxu3  ;;  %v226_v20 = vadd.f32 %v286_v17, %v225_v18 }
 0x13c   :  { %v249_v21 = vadd.f32 %v248_v19, %v226_v20 }
 0x13e   :  { %254 = vst [vmem:[#allocation10] sm:$0xff] %v249_v21 }
 0x141   :  { %v228_v22 = vpop.f32.mrf.mxu2 }
 0x142   :  { %v251_v23 = vpop.f32.mrf.mxu3  ;;  %v229_v24 = vadd.f32 %v286_v17, %v228_v22 }
 0x144   :  { %v252_v25 = vadd.f32 %v251_v23, %v229_v24 }
 0x146   :  { %255 = vst [vmem:[#allocation10 + $0x8] sm:$0xff] %v252_v25 }
 0x147   :  { %268 = dma.vmem_to_hbm [thread:$0]  %s261_s16, 256, %s263_s19, [#allocation4], %s419_s30, %s419_s30, %s420_s6  }
 0x148   :  { %413 = dma.done.wait [#allocation4], 256  }
 0x149   :  { %414 = vsyncadd [#allocation4], 4294967040 }
 0x14a   :  { %273 = vsyncpa [#allocation3], 1 }
 0x14b   :  { %274 = vsyncpa [#allocation6], 1 }
 0x14c   :  { %275 = vsyncpa [#allocation9], 1 }
 0x14d   :  { %276 = vsyncpa [#allocation4], 1 }

</bundles_post_ra>
